<compile_context>
chip_gen: v7x
topology: tpu7x:2x2x1
jax: 0.10.0
libtpu: 0.0.40
codegen_flags: <defaults>
</compile_context>

<pallas_src>
import math

import numpy as np
import jax
import jax.numpy as jnp
from jax import lax
from jax.experimental import pallas as pl
from jax.experimental.pallas import tpu as pltpu

# ----------------------------- model dimensions -----------------------------
B = 2                     # batch
C = 3                     # image channels
H = W = 16                # image spatial size
P = 4                     # patch size
GRID = H // P             # 4
N = GRID * GRID           # 16 patch tokens
PATCH_DIM = C * P * P     # 48
D = 32                    # feature / slot dim
K = 4                     # number of slots
NUM_CLASSES = 6           # osr classifier classes
HEAD_PAD = 8              # osr(6) + aux(1) + pad(1)
DH = 64                   # decoder hidden dim
ATTN_THRESHOLD = 0.3      # model['attention_threshold']
NOISE_THRESHOLD = 0.5     # model['noise_threshold'] (only used by the matcher)
SA_ITERS = 2              # slot attention iterations

BK = B * K                # 8
BN = B * N                # 32
BKN = B * K * N           # 128
OUT_W = 128               # lane-padded packed output width

# packed-slab lane/sublane layout (all offsets are multiples of 8)
# w_slab   (D, 200):  wkv[0:64] (wk pre-scaled) | w1[64:128] | wq[128:160]
#                     | wu[160:192] | w_heads[192:200]
# row_slab (1, 169):  b1[0:64] | w2a[64:128] | b_embed[128:160]
#                     | b_heads[160:168] | b2a[168:169]
# const_bk (BK, 200): slot_gather[0:128] | xbatch_bias[128:160]
#                     | slots_init[160:192] | group_sum[192:200]
# dec_const(BKN, 40): dec_sel[0:24] (pos_sel=[0:16], slot_expand=[16:24])
#                     | fold_sel (rows 0:BN) [24:40]
# embed_pos(64, D):   w_embed rows [0:48] | pos rows [48:64]
# out slab (BK, 128): slots[0:32] | heads[32:40] | attr[40:56] | masks[56:72]


# ----------------------------- fused forward kernel --------------------------
def _fused_net_kernel(patches_ref, embed_pos_ref, w_slab_ref, row_slab_ref,
                      const_bk_ref, dec_const_ref, out_ref):
    f32 = jnp.float32

    # ---- static slices of the packed inputs --------------------------------
    w_embed = embed_pos_ref[0:PATCH_DIM, :]                  # (48, D)
    pos = embed_pos_ref[PATCH_DIM:PATCH_DIM + N, :]          # (N, D)

    wkv = w_slab_ref[:, 0:2 * D]                             # (D, 2D)  wk pre-scaled
    w1 = w_slab_ref[:, 2 * D:2 * D + DH]                     # (D, DH)
    wq = w_slab_ref[:, 128:160]                              # (D, D)
    wu = w_slab_ref[:, 160:192]                              # (D, D)
    w_heads = w_slab_ref[:, 192:200]                         # (D, 8)

    b1 = row_slab_ref[:, 0:DH]                               # (1, DH)
    w2a = row_slab_ref[:, DH:2 * DH]                         # (1, DH)
    b_embed = row_slab_ref[:, 128:160]                       # (1, D)
    b_heads = row_slab_ref[:, 160:168]                       # (1, 8)
    b2a = row_slab_ref[:, 168:169]                           # (1, 1)

    slot_gather = const_bk_ref[:, 0:BKN]                     # (BK, BKN)
    xbias = const_bk_ref[:, 128:160]                         # (BK, BN)
    slots0 = const_bk_ref[:, 160:192]                        # (BK, D)
    group_sum = const_bk_ref[:, 192:200]                     # (BK, BK)

    dec_sel = dec_const_ref[:, 0:N + BK]                     # (BKN, 24)
    pos_sel = dec_const_ref[:, 0:N]                          # (BKN, N)
    fold_sel = dec_const_ref[0:BN, N + BK:N + BK + N]        # (BN, N)

    # ---- feature extractor: patch embedding --------------------------------
    feats = (jnp.dot(patches_ref[...], w_embed,
                     preferred_element_type=f32) + b_embed)  # (BN, D)

    # ---- slot attention (batch folded into 2-D matmuls) --------------------
    kv = jnp.dot(feats, wkv, preferred_element_type=f32)     # (BN, 2D)
    k_proj = kv[:, 0:D]                                      # already * 1/sqrt(D)
    v_proj = kv[:, D:2 * D]

    slots = slots0
    attn = None
    for _ in range(SA_ITERS):          # unrolled; tiny fixed trip count
        q = jnp.dot(slots, wq, preferred_element_type=f32)   # (BK, D)
        logits = lax.dot_general(q, k_proj, (((1,), (1,)), ((), ())),
                                 preferred_element_type=f32) + xbias   # (BK, BN)
        mmax = jnp.max(logits, axis=0, keepdims=True)
        e = jnp.exp(logits - mmax)
        attn = e * pl.reciprocal(jnp.sum(e, axis=0, keepdims=True) + 1e-8,
                                 approx=True)                 # slot softmax
        attn_n = attn * pl.reciprocal(jnp.sum(attn, axis=1, keepdims=True)
                                      + 1e-8, approx=True)    # token mean
        updates = jnp.dot(attn_n, v_proj, preferred_element_type=f32)  # (BK, D)
        # TODO(synk): reference grouping uses GRU + residual-MLP slot update.
        slots = jnp.dot(updates, wu, preferred_element_type=f32)

    # fold the block-diagonal (BK, BN) attention map into (BK, N)
    attr = jnp.dot(attn, fold_sel, preferred_element_type=f32)          # (BK, N)

    # ---- fused osr + aux classifier heads (slots already in VMEM) ----------
    heads = (jnp.dot(slots, w_heads, preferred_element_type=f32)
             + b_heads)                                                 # (BK, 8)

    # ---- object decoder: one M = B*K*N row matmul ---------------------------
    pos_slots = jnp.concatenate([pos, slots], axis=0)                   # (24, D)
    z = jnp.dot(dec_sel, pos_slots, preferred_element_type=f32)         # (BKN, D)
    h = jnp.maximum(jnp.dot(z, w1, preferred_element_type=f32) + b1, 0.0)  # (BKN, DH)
    # width-1 output layer: VPU multiply + lane reduce (no (DH,1) MXU matmul)
    a_col = jnp.sum(h * w2a, axis=-1, keepdims=True) + b2a              # (BKN, 1)
    alpha = jnp.dot(slot_gather, a_col * pos_sel,
                    preferred_element_type=f32)                         # (BK, N)

    # grouped per-image softmax over the K slot rows (no sublane slicing)
    m = jnp.max(alpha, axis=0, keepdims=True)                           # (1, N)
    em = jnp.exp(alpha - m)
    sums = jnp.dot(group_sum, em, preferred_element_type=f32)           # (BK, N)
    masks = em * pl.reciprocal(sums + 1e-8, approx=True)                # (BK, N)

    # ---- one lane-dense packed output store ---------------------------------
    out_ref[...] = jnp.concatenate(
        [slots, heads, attr, masks,
         jnp.zeros((BK, OUT_W - (D + HEAD_PAD + 2 * N)), f32)], axis=1)  # (BK, 128)


def _fused_forward(patches, embed_pos, w_slab, row_slab, const_bk, dec_const):
    args = (patches, embed_pos, w_slab, row_slab, const_bk, dec_const)
    out_shape = jax.ShapeDtypeStruct((BK, OUT_W), jnp.float32)
    bytes_accessed = 4 * (sum(int(a.size) for a in args) + BK * OUT_W)
    return pl.pallas_call(
        _fused_net_kernel,
        out_shape=out_shape,
        grid=(1,),  # whole model is VMEM-resident; single invocation
        in_specs=[pl.BlockSpec(a.shape, lambda i: (0, 0)) for a in args],
        out_specs=pl.BlockSpec((BK, OUT_W), lambda i: (0, 0)),
        compiler_params=pltpu.CompilerParams(
            dimension_semantics=("arbitrary",)),
        cost_estimate=pl.CostEstimate(flops=1_200_000, transcendentals=800,
                                      bytes_accessed=bytes_accessed),
    )(*args)


# ----------------------------- parameters ------------------------------------
def init_params(key):
    """Builds raw weights, then packs them (and all constant selection
    matrices) into the 5 lane/sublane-aligned slabs the kernel consumes."""
    ks = jax.random.split(key, 16)

    def init(k, shape, scale=0.05):
        return np.asarray(scale * jax.random.normal(k, shape), dtype=np.float32)

    # raw weights -------------------------------------------------------------
    w_embed = init(ks[0], (PATCH_DIM, D))
    b_embed = np.zeros((D,), np.float32)
    slot_mu = init(ks[1], (K, D))
    wq = init(ks[2], (D, D))
    wk = init(ks[3], (D, D))
    wv = init(ks[4], (D, D))
    wu = init(ks[5], (D, D))
    w_cls = init(ks[6], (D, NUM_CLASSES))
    b_cls = np.zeros((NUM_CLASSES,), np.float32)
    w_aux = init(ks[7], (D, 1))
    b_aux = np.zeros((1,), np.float32)
    pos = init(ks[8], (N, D))
    w1 = init(ks[9], (D, DH))
    b1 = np.zeros((DH,), np.float32)
    w2a = init(ks[10], (DH, 1))
    b2a = np.zeros((1,), np.float32)

    scale = 1.0 / math.sqrt(D)

    # packed weight slabs -----------------------------------------------------
    embed_pos = np.concatenate([w_embed, pos], axis=0)                  # (64, D)

    w_heads = np.concatenate(
        [w_cls, w_aux, np.zeros((D, HEAD_PAD - NUM_CLASSES - 1), np.float32)],
        axis=1)                                                         # (D, 8)
    w_slab = np.concatenate(
        [wk * scale, wv, w1, wq, wu, w_heads], axis=1)                  # (D, 200)

    b_heads = np.concatenate(
        [b_cls, b_aux, np.zeros((HEAD_PAD - NUM_CLASSES - 1,), np.float32)])
    row_slab = np.concatenate(
        [b1, w2a.reshape(-1), b_embed, b_heads, b2a])[None, :]          # (1, 169)

    # constant selection matrices / bias --------------------------------------
    r_bkn = np.arange(BKN)
    pos_sel = (r_bkn[:, None] % N == np.arange(N)[None, :]).astype(np.float32)
    slot_expand = (r_bkn[:, None] // N == np.arange(BK)[None, :]).astype(np.float32)
    fold_sel = (np.arange(BN)[:, None] % N
                == np.arange(N)[None, :]).astype(np.float32)            # (BN, N)
    fold_pad = np.zeros((BKN, N), np.float32)
    fold_pad[:BN, :] = fold_sel
    dec_const = np.concatenate([pos_sel, slot_expand, fold_pad], axis=1)  # (BKN, 40)

    slot_gather = (np.arange(BK)[:, None]
                   == np.arange(BKN)[None, :] // N).astype(np.float32)  # (BK, BKN)
    xbias = np.where(np.arange(BK)[:, None] // K == np.arange(BN)[None, :] // N,
                     0.0, -1e9).astype(np.float32)                      # (BK, BN)
    slots_init = np.tile(slot_mu, (B, 1)).astype(np.float32)            # (BK, D)
    group_sum = (np.arange(BK)[:, None] // K
                 == np.arange(BK)[None, :] // K).astype(np.float32)     # (BK, BK)
    const_bk = np.concatenate(
        [slot_gather, xbias, slots_init, group_sum], axis=1)            # (BK, 200)

    return {
        "embed_pos": jnp.asarray(embed_pos),
        "w_slab": jnp.asarray(w_slab),
        "row_slab": jnp.asarray(row_slab),
        "const_bk": jnp.asarray(const_bk),
        "dec_const": jnp.asarray(dec_const),
    }


# ----------------------------- forward pass ----------------------------------
def net_forward(images, params):
    # patch extraction (pure layout) stays in XLA
    patches = images.reshape(B, C, GRID, P, GRID, P)
    patches = jnp.transpose(patches, (0, 2, 4, 1, 3, 5)).reshape(BN, PATCH_DIM)

    out_slab = _fused_forward(patches, params["embed_pos"], params["w_slab"],
                              params["row_slab"], params["const_bk"],
                              params["dec_const"])

    slots = out_slab[:, 0:D].reshape(B, K, D)
    heads = out_slab[:, D:D + HEAD_PAD].reshape(B, K, HEAD_PAD)
    fg_pred = heads[..., :NUM_CLASSES]                       # (B, K, NUM_CLASSES)
    bg_pred = heads[..., NUM_CLASSES]                        # (B, K)
    feat_attr = out_slab[:, 40:56].reshape(B, K, N)
    masks = out_slab[:, 56:72].reshape(B, K, GRID, GRID)     # lane-dense in slab

    # get_valid_slots: thresholded-mask area check.
    # TODO(synk): cv2.connectedComponentsWithStats (largest component area)
    #             has no Pallas equivalent; total thresholded area used instead.
    valid_slots = ((masks > ATTN_THRESHOLD).sum(axis=(-2, -1)) >= 2
                   ).astype(jnp.int32)                       # (B, K)

    # TODO(synk): Hungarian loss matcher uses scipy.optimize.linear_sum_assignment
    #             (host-side); it only runs when 'class_label' is present.
    return {
        "slots": slots,
        "fg_pred": fg_pred,
        "bg_pred": bg_pred,
        "valid_slots": valid_slots,
        "masks": masks,
        "feature_attributions": feat_attr,
    }


# ----------------------------- main -------------------------------------------
if __name__ == "__main__":
    key = jax.random.PRNGKey(0)
    k_img, k_par = jax.random.split(key)
    images = jax.random.normal(k_img, (B, C, H, W), dtype=jnp.float32)
    params = init_params(k_par)

    forward = jax.jit(net_forward)
    out = forward(images, params)
    jax.block_until_ready(out)

    assert out["slots"].shape == (B, K, D)
    assert out["fg_pred"].shape == (B, K, NUM_CLASSES)
    assert out["bg_pred"].shape == (B, K)
    assert out["valid_slots"].shape == (B, K)
    assert out["masks"].shape == (B, K, GRID, GRID)
    assert out["feature_attributions"].shape == (B, K, N)
    print("KERNEL_OK")
</pallas_src>

<mosaic_0001>
module attributes {stable_mosaic.version = 11 : i64} {
  func.func @_fused_net_kernel(%arg0: i32, %arg1: memref<32x48xf32, #tpu.memory_space<vmem>>, %arg2: memref<64x32xf32, #tpu.memory_space<vmem>>, %arg3: memref<32x200xf32, #tpu.memory_space<vmem>>, %arg4: memref<1x169xf32, #tpu.memory_space<vmem>>, %arg5: memref<8x200xf32, #tpu.memory_space<vmem>>, %arg6: memref<128x40xf32, #tpu.memory_space<vmem>>, %arg7: memref<8x128xf32, #tpu.memory_space<vmem>>) attributes {dimension_semantics = [#tpu.dimension_semantics<arbitrary>], iteration_bounds = array<i64: 1>, scalar_prefetch = 0 : i64, scratch_operands = 0 : i64, tpu.core_type = #tpu.core_type<tc>, window_params = [{pipeline_mode = #tpu.pipeline_mode<synchronous>, transform_indices = @transform_0, window_bounds = array<i64: 32, 48>}, {pipeline_mode = #tpu.pipeline_mode<synchronous>, transform_indices = @transform_1, window_bounds = array<i64: 64, 32>}, {pipeline_mode = #tpu.pipeline_mode<synchronous>, transform_indices = @transform_2, window_bounds = array<i64: 32, 200>}, {pipeline_mode = #tpu.pipeline_mode<synchronous>, transform_indices = @transform_3, window_bounds = array<i64: 1, 169>}, {pipeline_mode = #tpu.pipeline_mode<synchronous>, transform_indices = @transform_4, window_bounds = array<i64: 8, 200>}, {pipeline_mode = #tpu.pipeline_mode<synchronous>, transform_indices = @transform_5, window_bounds = array<i64: 128, 40>}, {pipeline_mode = #tpu.pipeline_mode<synchronous>, transform_indices = @transform_6, window_bounds = array<i64: 8, 128>}]} {
    %c0 = arith.constant 0 : index
    %c0_0 = arith.constant 0 : index
    %0 = vector.load %arg2[%c0, %c0_0] : memref<64x32xf32, #tpu.memory_space<vmem>>, vector<48x32xf32>
    %c48 = arith.constant 48 : index
    %c0_1 = arith.constant 0 : index
    %1 = vector.load %arg2[%c48, %c0_1] : memref<64x32xf32, #tpu.memory_space<vmem>>, vector<16x32xf32>
    %c0_2 = arith.constant 0 : index
    %c0_3 = arith.constant 0 : index
    %2 = vector.load %arg3[%c0_2, %c0_3] : memref<32x200xf32, #tpu.memory_space<vmem>>, vector<32x64xf32>
    %c0_4 = arith.constant 0 : index
    %c64 = arith.constant 64 : index
    %3 = vector.load %arg3[%c0_4, %c64] : memref<32x200xf32, #tpu.memory_space<vmem>>, vector<32x64xf32>
    %c0_5 = arith.constant 0 : index
    %c128 = arith.constant 128 : index
    %4 = vector.load %arg3[%c0_5, %c128] : memref<32x200xf32, #tpu.memory_space<vmem>>, vector<32x32xf32>
    %c0_6 = arith.constant 0 : index
    %c160 = arith.constant 160 : index
    %5 = vector.load %arg3[%c0_6, %c160] : memref<32x200xf32, #tpu.memory_space<vmem>>, vector<32x32xf32>
    %c0_7 = arith.constant 0 : index
    %c192 = arith.constant 192 : index
    %6 = vector.load %arg3[%c0_7, %c192] : memref<32x200xf32, #tpu.memory_space<vmem>>, vector<32x8xf32>
    %c0_8 = arith.constant 0 : index
    %c0_9 = arith.constant 0 : index
    %7 = vector.load %arg4[%c0_8, %c0_9] : memref<1x169xf32, #tpu.memory_space<vmem>>, vector<1x64xf32>
    %c0_10 = arith.constant 0 : index
    %c64_11 = arith.constant 64 : index
    %8 = vector.load %arg4[%c0_10, %c64_11] : memref<1x169xf32, #tpu.memory_space<vmem>>, vector<1x64xf32>
    %c0_12 = arith.constant 0 : index
    %c128_13 = arith.constant 128 : index
    %9 = vector.load %arg4[%c0_12, %c128_13] : memref<1x169xf32, #tpu.memory_space<vmem>>, vector<1x32xf32>
    %c0_14 = arith.constant 0 : index
    %c160_15 = arith.constant 160 : index
    %10 = vector.load %arg4[%c0_14, %c160_15] : memref<1x169xf32, #tpu.memory_space<vmem>>, vector<1x8xf32>
    %c0_16 = arith.constant 0 : index
    %c168 = arith.constant 168 : index
    %11 = vector.load %arg4[%c0_16, %c168] : memref<1x169xf32, #tpu.memory_space<vmem>>, vector<1x1xf32>
    %c0_17 = arith.constant 0 : index
    %c0_18 = arith.constant 0 : index
    %12 = vector.load %arg5[%c0_17, %c0_18] : memref<8x200xf32, #tpu.memory_space<vmem>>, vector<8x128xf32>
    %c0_19 = arith.constant 0 : index
    %c128_20 = arith.constant 128 : index
    %13 = vector.load %arg5[%c0_19, %c128_20] : memref<8x200xf32, #tpu.memory_space<vmem>>, vector<8x32xf32>
    %c0_21 = arith.constant 0 : index
    %c160_22 = arith.constant 160 : index
    %14 = vector.load %arg5[%c0_21, %c160_22] : memref<8x200xf32, #tpu.memory_space<vmem>>, vector<8x32xf32>
    %c0_23 = arith.constant 0 : index
    %c192_24 = arith.constant 192 : index
    %15 = vector.load %arg5[%c0_23, %c192_24] : memref<8x200xf32, #tpu.memory_space<vmem>>, vector<8x8xf32>
    %c0_25 = arith.constant 0 : index
    %c0_26 = arith.constant 0 : index
    %16 = vector.load %arg6[%c0_25, %c0_26] : memref<128x40xf32, #tpu.memory_space<vmem>>, vector<128x24xf32>
    %c0_27 = arith.constant 0 : index
    %c0_28 = arith.constant 0 : index
    %17 = vector.load %arg6[%c0_27, %c0_28] : memref<128x40xf32, #tpu.memory_space<vmem>>, vector<128x16xf32>
    %c0_29 = arith.constant 0 : index
    %c24 = arith.constant 24 : index
    %18 = vector.load %arg6[%c0_29, %c24] : memref<128x40xf32, #tpu.memory_space<vmem>>, vector<32x16xf32>
    %c0_30 = arith.constant 0 : index
    %c0_31 = arith.constant 0 : index
    %19 = vector.load %arg1[%c0_30, %c0_31] : memref<32x48xf32, #tpu.memory_space<vmem>>, vector<32x48xf32>
    %cst = arith.constant dense<0.000000e+00> : vector<32x32xf32>
    %20 = tpu.matmul %19, %0, %cst {dimension_numbers = #tpu.dot_dimension_numbers<[1], [0], [0], [1], [0, 0, 1, 1], [], []>} : vector<32x48xf32>, vector<48x32xf32>, vector<32x32xf32> -> vector<32x32xf32>
    %21 = vector.broadcast %9 : vector<1x32xf32> to vector<32x32xf32>
    %22 = arith.addf %20, %21 : vector<32x32xf32>
    %cst_32 = arith.constant dense<0.000000e+00> : vector<32x64xf32>
    %23 = tpu.matmul %22, %2, %cst_32 {dimension_numbers = #tpu.dot_dimension_numbers<[1], [0], [0], [1], [0, 0, 1, 1], [], []>} : vector<32x32xf32>, vector<32x64xf32>, vector<32x64xf32> -> vector<32x64xf32>
    %24 = vector.extract_strided_slice %23 {offsets = [0, 0], sizes = [32, 32], strides = [1, 1]} : vector<32x64xf32> to vector<32x32xf32>
    %25 = vector.extract_strided_slice %23 {offsets = [0, 32], sizes = [32, 32], strides = [1, 1]} : vector<32x64xf32> to vector<32x32xf32>
    %cst_33 = arith.constant dense<0.000000e+00> : vector<8x32xf32>
    %26 = tpu.matmul %14, %4, %cst_33 {dimension_numbers = #tpu.dot_dimension_numbers<[1], [0], [0], [1], [0, 0, 1, 1], [], []>} : vector<8x32xf32>, vector<32x32xf32>, vector<8x32xf32> -> vector<8x32xf32>
    %cst_34 = arith.constant dense<0.000000e+00> : vector<8x32xf32>
    %27 = tpu.matmul %26, %24, %cst_34 {dimension_numbers = #tpu.dot_dimension_numbers<[1], [1], [0], [0], [0, 0, 1, 0], [], []>} : vector<8x32xf32>, vector<32x32xf32>, vector<8x32xf32> -> vector<8x32xf32>
    %28 = arith.addf %27, %13 : vector<8x32xf32>
    %cst_35 = arith.constant dense<0xFF800000> : vector<32xf32>
    %29 = vector.multi_reduction <maximumf>, %28, %cst_35 [0] : vector<8x32xf32> to vector<32xf32>
    %30 = vector.shape_cast %29 : vector<32xf32> to vector<1x32xf32>
    %31 = vector.broadcast %30 : vector<1x32xf32> to vector<8x32xf32>
    %32 = arith.subf %28, %31 : vector<8x32xf32>
    %33 = math.exp %32 : vector<8x32xf32>
    %cst_36 = arith.constant dense<0.000000e+00> : vector<32xf32>
    %34 = vector.multi_reduction <add>, %33, %cst_36 [0] : vector<8x32xf32> to vector<32xf32>
    %35 = vector.shape_cast %34 : vector<32xf32> to vector<1x32xf32>
    %cst_37 = arith.constant 9.99999993E-9 : f32
    %36 = vector.broadcast %cst_37 : f32 to vector<1x32xf32>
    %37 = arith.addf %35, %36 : vector<1x32xf32>
    %38 = tpu.reciprocal %37 {approx = true} : vector<1x32xf32> -> vector<1x32xf32>
    %39 = vector.broadcast %38 : vector<1x32xf32> to vector<8x32xf32>
    %40 = arith.mulf %33, %39 : vector<8x32xf32>
    %cst_38 = arith.constant dense<0.000000e+00> : vector<8xf32>
    %41 = vector.multi_reduction <add>, %40, %cst_38 [1] : vector<8x32xf32> to vector<8xf32>
    %42 = vector.shape_cast %41 : vector<8xf32> to vector<8x1xf32>
    %cst_39 = arith.constant 9.99999993E-9 : f32
    %43 = vector.broadcast %cst_39 : f32 to vector<8x1xf32>
    %44 = arith.addf %42, %43 : vector<8x1xf32>
    %45 = tpu.reciprocal %44 {approx = true} : vector<8x1xf32> -> vector<8x1xf32>
    %46 = vector.broadcast %45 : vector<8x1xf32> to vector<8x32xf32>
    %47 = arith.mulf %40, %46 : vector<8x32xf32>
    %cst_40 = arith.constant dense<0.000000e+00> : vector<8x32xf32>
    %48 = tpu.matmul %47, %25, %cst_40 {dimension_numbers = #tpu.dot_dimension_numbers<[1], [0], [0], [1], [0, 0, 1, 1], [], []>} : vector<8x32xf32>, vector<32x32xf32>, vector<8x32xf32> -> vector<8x32xf32>
    %cst_41 = arith.constant dense<0.000000e+00> : vector<8x32xf32>
    %49 = tpu.matmul %48, %5, %cst_41 {dimension_numbers = #tpu.dot_dimension_numbers<[1], [0], [0], [1], [0, 0, 1, 1], [], []>} : vector<8x32xf32>, vector<32x32xf32>, vector<8x32xf32> -> vector<8x32xf32>
    %cst_42 = arith.constant dense<0.000000e+00> : vector<8x32xf32>
    %50 = tpu.matmul %49, %4, %cst_42 {dimension_numbers = #tpu.dot_dimension_numbers<[1], [0], [0], [1], [0, 0, 1, 1], [], []>} : vector<8x32xf32>, vector<32x32xf32>, vector<8x32xf32> -> vector<8x32xf32>
    %cst_43 = arith.constant dense<0.000000e+00> : vector<8x32xf32>
    %51 = tpu.matmul %50, %24, %cst_43 {dimension_numbers = #tpu.dot_dimension_numbers<[1], [1], [0], [0], [0, 0, 1, 0], [], []>} : vector<8x32xf32>, vector<32x32xf32>, vector<8x32xf32> -> vector<8x32xf32>
    %52 = arith.addf %51, %13 : vector<8x32xf32>
    %cst_44 = arith.constant dense<0xFF800000> : vector<32xf32>
    %53 = vector.multi_reduction <maximumf>, %52, %cst_44 [0] : vector<8x32xf32> to vector<32xf32>
    %54 = vector.shape_cast %53 : vector<32xf32> to vector<1x32xf32>
    %55 = vector.broadcast %54 : vector<1x32xf32> to vector<8x32xf32>
    %56 = arith.subf %52, %55 : vector<8x32xf32>
    %57 = math.exp %56 : vector<8x32xf32>
    %cst_45 = arith.constant dense<0.000000e+00> : vector<32xf32>
    %58 = vector.multi_reduction <add>, %57, %cst_45 [0] : vector<8x32xf32> to vector<32xf32>
    %59 = vector.shape_cast %58 : vector<32xf32> to vector<1x32xf32>
    %cst_46 = arith.constant 9.99999993E-9 : f32
    %60 = vector.broadcast %cst_46 : f32 to vector<1x32xf32>
    %61 = arith.addf %59, %60 : vector<1x32xf32>
    %62 = tpu.reciprocal %61 {approx = true} : vector<1x32xf32> -> vector<1x32xf32>
    %63 = vector.broadcast %62 : vector<1x32xf32> to vector<8x32xf32>
    %64 = arith.mulf %57, %63 : vector<8x32xf32>
    %cst_47 = arith.constant dense<0.000000e+00> : vector<8xf32>
    %65 = vector.multi_reduction <add>, %64, %cst_47 [1] : vector<8x32xf32> to vector<8xf32>
    %66 = vector.shape_cast %65 : vector<8xf32> to vector<8x1xf32>
    %cst_48 = arith.constant 9.99999993E-9 : f32
    %67 = vector.broadcast %cst_48 : f32 to vector<8x1xf32>
    %68 = arith.addf %66, %67 : vector<8x1xf32>
    %69 = tpu.reciprocal %68 {approx = true} : vector<8x1xf32> -> vector<8x1xf32>
    %70 = vector.broadcast %69 : vector<8x1xf32> to vector<8x32xf32>
    %71 = arith.mulf %64, %70 : vector<8x32xf32>
    %cst_49 = arith.constant dense<0.000000e+00> : vector<8x32xf32>
    %72 = tpu.matmul %71, %25, %cst_49 {dimension_numbers = #tpu.dot_dimension_numbers<[1], [0], [0], [1], [0, 0, 1, 1], [], []>} : vector<8x32xf32>, vector<32x32xf32>, vector<8x32xf32> -> vector<8x32xf32>
    %cst_50 = arith.constant dense<0.000000e+00> : vector<8x32xf32>
    %73 = tpu.matmul %72, %5, %cst_50 {dimension_numbers = #tpu.dot_dimension_numbers<[1], [0], [0], [1], [0, 0, 1, 1], [], []>} : vector<8x32xf32>, vector<32x32xf32>, vector<8x32xf32> -> vector<8x32xf32>
    %cst_51 = arith.constant dense<0.000000e+00> : vector<8x16xf32>
    %74 = tpu.matmul %64, %18, %cst_51 {dimension_numbers = #tpu.dot_dimension_numbers<[1], [0], [0], [1], [0, 0, 1, 1], [], []>} : vector<8x32xf32>, vector<32x16xf32>, vector<8x16xf32> -> vector<8x16xf32>
    %cst_52 = arith.constant dense<0.000000e+00> : vector<8x8xf32>
    %75 = tpu.matmul %73, %6, %cst_52 {dimension_numbers = #tpu.dot_dimension_numbers<[1], [0], [0], [1], [0, 0, 1, 1], [], []>} : vector<8x32xf32>, vector<32x8xf32>, vector<8x8xf32> -> vector<8x8xf32>
    %76 = vector.broadcast %10 : vector<1x8xf32> to vector<8x8xf32>
    %77 = arith.addf %75, %76 : vector<8x8xf32>
    %78 = tpu.concatenate %1, %73 in 0 : vector<16x32xf32>, vector<8x32xf32> -> vector<24x32xf32>
    %cst_53 = arith.constant dense<0.000000e+00> : vector<128x32xf32>
    %79 = tpu.matmul %16, %78, %cst_53 {dimension_numbers = #tpu.dot_dimension_numbers<[1], [0], [0], [1], [0, 0, 1, 1], [], []>} : vector<128x24xf32>, vector<24x32xf32>, vector<128x32xf32> -> vector<128x32xf32>
    %cst_54 = arith.constant dense<0.000000e+00> : vector<128x64xf32>
    %80 = tpu.matmul %79, %3, %cst_54 {dimension_numbers = #tpu.dot_dimension_numbers<[1], [0], [0], [1], [0, 0, 1, 1], [], []>} : vector<128x32xf32>, vector<32x64xf32>, vector<128x64xf32> -> vector<128x64xf32>
    %81 = vector.broadcast %7 : vector<1x64xf32> to vector<128x64xf32>
    %82 = arith.addf %80, %81 : vector<128x64xf32>
    %cst_55 = arith.constant 0.000000e+00 : f32
    %83 = vector.broadcast %cst_55 : f32 to vector<128x64xf32>
    %84 = arith.maximumf %82, %83 : vector<128x64xf32>
    %85 = vector.broadcast %8 : vector<1x64xf32> to vector<128x64xf32>
    %86 = arith.mulf %84, %85 : vector<128x64xf32>
    %cst_56 = arith.constant dense<0.000000e+00> : vector<128xf32>
    %87 = vector.multi_reduction <add>, %86, %cst_56 [1] : vector<128x64xf32> to vector<128xf32>
    %88 = vector.shape_cast %87 : vector<128xf32> to vector<128x1xf32>
    %89 = vector.broadcast %11 : vector<1x1xf32> to vector<128x1xf32>
    %90 = arith.addf %88, %89 : vector<128x1xf32>
    %91 = vector.broadcast %90 : vector<128x1xf32> to vector<128x16xf32>
    %92 = arith.mulf %91, %17 : vector<128x16xf32>
    %cst_57 = arith.constant dense<0.000000e+00> : vector<8x16xf32>
    %93 = tpu.matmul %12, %92, %cst_57 {dimension_numbers = #tpu.dot_dimension_numbers<[1], [0], [0], [1], [0, 0, 1, 1], [], []>} : vector<8x128xf32>, vector<128x16xf32>, vector<8x16xf32> -> vector<8x16xf32>
    %cst_58 = arith.constant dense<0xFF800000> : vector<16xf32>
    %94 = vector.multi_reduction <maximumf>, %93, %cst_58 [0] : vector<8x16xf32> to vector<16xf32>
    %95 = vector.shape_cast %94 : vector<16xf32> to vector<1x16xf32>
    %96 = vector.broadcast %95 : vector<1x16xf32> to vector<8x16xf32>
    %97 = arith.subf %93, %96 : vector<8x16xf32>
    %98 = math.exp %97 : vector<8x16xf32>
    %cst_59 = arith.constant dense<0.000000e+00> : vector<8x16xf32>
    %99 = tpu.matmul %15, %98, %cst_59 {dimension_numbers = #tpu.dot_dimension_numbers<[1], [0], [0], [1], [0, 0, 1, 1], [], []>} : vector<8x8xf32>, vector<8x16xf32>, vector<8x16xf32> -> vector<8x16xf32>
    %cst_60 = arith.constant 9.99999993E-9 : f32
    %100 = vector.broadcast %cst_60 : f32 to vector<8x16xf32>
    %101 = arith.addf %99, %100 : vector<8x16xf32>
    %102 = tpu.reciprocal %101 {approx = true} : vector<8x16xf32> -> vector<8x16xf32>
    %103 = arith.mulf %98, %102 : vector<8x16xf32>
    %cst_61 = arith.constant 0.000000e+00 : f32
    %104 = vector.broadcast %cst_61 : f32 to vector<8x56xf32>
    %105 = tpu.concatenate %73, %77, %74, %103, %104 in 1 : vector<8x32xf32>, vector<8x8xf32>, vector<8x16xf32>, vector<8x16xf32>, vector<8x56xf32> -> vector<8x128xf32>
    %c0_62 = arith.constant 0 : index
    %c0_63 = arith.constant 0 : index
    %106 = vector.load %arg7[%c0_62, %c0_63] : memref<8x128xf32, #tpu.memory_space<vmem>>, vector<8x128xf32>
    tpu.vector_store %arg7[%c0_62, %c0_63], %105 {strides = array<i32>} : memref<8x128xf32, #tpu.memory_space<vmem>>, vector<8x128xf32>,
    return
  }
  func.func @transform_0(%arg0: i32) -> (i32, i32) {
    %c0_i32 = arith.constant 0 : i32
    %c0_i32_0 = arith.constant 0 : i32
    %c0_i32_1 = arith.constant 0 : i32
    return %c0_i32, %c0_i32_0 : i32, i32
  }
  func.func @transform_1(%arg0: i32) -> (i32, i32) {
    %c0_i32 = arith.constant 0 : i32
    %c0_i32_0 = arith.constant 0 : i32
    %c0_i32_1 = arith.constant 0 : i32
    return %c0_i32, %c0_i32_0 : i32, i32
  }
  func.func @transform_2(%arg0: i32) -> (i32, i32) {
    %c0_i32 = arith.constant 0 : i32
    %c0_i32_0 = arith.constant 0 : i32
    %c0_i32_1 = arith.constant 0 : i32
    return %c0_i32, %c0_i32_0 : i32, i32
  }
  func.func @transform_3(%arg0: i32) -> (i32, i32) {
    %c0_i32 = arith.constant 0 : i32
    %c0_i32_0 = arith.constant 0 : i32
    %c0_i32_1 = arith.constant 0 : i32
    return %c0_i32, %c0_i32_0 : i32, i32
  }
  func.func @transform_4(%arg0: i32) -> (i32, i32) {
    %c0_i32 = arith.constant 0 : i32
    %c0_i32_0 = arith.constant 0 : i32
    %c0_i32_1 = arith.constant 0 : i32
    return %c0_i32, %c0_i32_0 : i32, i32
  }
  func.func @transform_5(%arg0: i32) -> (i32, i32) {
    %c0_i32 = arith.constant 0 : i32
    %c0_i32_0 = arith.constant 0 : i32
    %c0_i32_1 = arith.constant 0 : i32
    return %c0_i32, %c0_i32_0 : i32, i32
  }
  func.func @transform_6(%arg0: i32) -> (i32, i32) {
    %c0_i32 = arith.constant 0 : i32
    %c0_i32_0 = arith.constant 0 : i32
    %c0_i32_1 = arith.constant 0 : i32
    return %c0_i32, %c0_i32_0 : i32, i32
  }
}

</mosaic_0001>

<bundles_post_ra>
// kernel: net_forward.1
= control target key start
LH: loop header
LB: loop body
LE: loop exit
PB: predicated region body
PF: predicated region fallthrough
CT: control target
= control target key end

     0   :  { %vm69_vm0 = vcmask 392192   ;;  %s2532_s13 = smov 96   ;;  %v2533_v21 = vmov 0.0|0.0   ;;  %vm2534_vm1 = vmmov 0   ;;  %v2535_v22 = vmov 0.0   ;;  %s2536_s17 = smov 104   ;;  %s3067_s1 = inlined_call_operand.vmem [shape: f32[64,32], index: 1, kind: input, shape index: {}]   ;;  %s3068_s0 = inlined_call_operand.vmem [shape: f32[32,48], index: 0, kind: input, shape index: {}]   ;;  %s3069_s4 = inlined_call_operand.vmem [shape: f32[8,200], index: 4, kind: input, shape index: {}]   ;;  %s3070_s2 = inlined_call_operand.vmem [shape: f32[32,200], index: 2, kind: input, shape index: {}]   ;;  %s3071_s3 = inlined_call_operand.vmem [shape: f32[1,169], index: 3, kind: input, shape index: {}]   ;;  %s3072_s5 = inlined_call_operand.vmem [shape: f32[128,40], index: 5, kind: input, shape index: {}]   ;;  %s3073_s6 = inlined_call_operand.vmem [shape: f32[8,128], index: 6, kind: output, shape index: {}]  }
   0x1   :  { %v23_v0 = vld [vmem:[%s3067_s1] sm:$0xff]  ;;  %v24_v1 = vld [vmem:[%s3067_s1 + $0x8] sm:$0xff]  ;;  %v25_v2 = vld [vmem:[%s3067_s1 + $0x10] sm:$0xff]  ;;  %vm167_vm2 = vcmask 261120   ;;  %s2537_s22 = smov 64   ;;  %vm1120_vm4 = vcmask 195584  }
   0x2   :  { %v2334_v3 = vpack.c.bf16 %v24_v1, %v23_v0  ;;  %v26_v4 = vld [vmem:[%s3067_s1 + $0x18] sm:$0xff]  ;;  %v27_v6 = vld [vmem:[%s3067_s1 + $0x20] sm:$0xff]  ;;  %v28_v7 = vld [vmem:[%s3067_s1 + $0x28] sm:$0xff]  ;;  %vm1560_vm5 = vcmask 523264   ;;  %vm1791_vm6 = vcmask 130048   ;;  %vm1804_vm7 = vcmask 64512  }
   0x3   :  { %v2338_v5 = vpack.c.bf16 %v26_v4, %v25_v2  ;;  %v59_v8 = vld [vmem:[%s3068_s0] sm:$0xff]  ;;  %v2602_v9 = vld [vmem:[%s3069_s4 + $0x8] sm:$0xff]  ;;  %v2614_v11 = vld [vmem:[%s3070_s2 + $0x10] sm:$0xff]  ;;  %v2342_v12 = vpack.c.bf16 %v28_v7, %v27_v6  ;;  %vm1892_vm8 = vcmask 326656   ;;  %vm1894_vm9 = vcmask 457728  }
   0x4   :  { %2335 = vmatprep.subr.bf16.mxu0 %v2334_v3  ;;  %2102 = vmatprep.mubr.msk.f32.mxu0 %vm69_vm0, %v59_v8  ;;  %v2609_v10 = vld [vmem:[%s3070_s2] sm:$0xff]  ;;  %v60_v15 = vld [vmem:[%s3068_s0 + $0x8] sm:$0xff]  ;;  %v61_v16 = vld [vmem:[%s3068_s0 + $0x10] sm:$0xff]  ;;  %vm1896_vm10 = vcmask 588800  }
   0x5   :  { %2337 = vmatpush3.bf16.msra.mxu0 %v2334_v3  ;;  %266 = vrot.lane.b32.xlu0 %v2602_v9, %s2532_s13  ;;  %v2504_v13 = vpack.i.bf16 %v2614_v11, %v2609_v10  ;;  %v2346_v14 = vpack.c.bf16 %v2614_v11, %v2609_v10  ;;  %v62_v17 = vld [vmem:[%s3068_s0 + $0x18] sm:$0xff]  ;;  %v2635_v18 = vld [vmem:[%s3070_s2 + $0x20] sm:$0xff]  ;;  %v2640_v19 = vld [vmem:[%s3070_s2 + $0x30] sm:$0xff] }
   0x6   :  { %2339 = vmatprep.subr.bf16.mxu0 %v2338_v5  ;;  %v2350_v20 = vpack.c.bf16 %v2640_v19, %v2635_v18  ;;  %v2651_v23 = vld [vmem:[%s3071_s3 + $0x1] ss:$0 sm:$0xff]  ;;  %v2656_v24 = vld [vmem:[%s3070_s2 + $0x8] sm:$0xff]  ;;  %v2661_v25 = vld [vmem:[%s3070_s2 + $0x18] sm:$0xff]  ;;  %v2509_v10 = vpack.i.bf16 %v2640_v19, %v2635_v18 }
   0x7   :  { %2347 = vmatprep.subr.bf16.mxu1 %v2346_v14  ;;  %v2355_v29 = vpack.c.bf16 %v2661_v25, %v2656_v24  ;;  %v2670_v31 = vld [vmem:[%s3070_s2 + $0x28] sm:$0xff]  ;;  %v2675_v32 = vld [vmem:[%s3070_s2 + $0x38] sm:$0xff]  ;;  %vm2694_vm3 = vmpackc.low %vm167_vm2, %vm167_vm2 }
   0x8   :  { %2349 = vmatpush3.bf16.msra.mxu1 %v2346_v14  ;;  %v2358_v37 = vpack.c.bf16 %v2675_v32, %v2670_v31  ;;  %v2851_v18 = vld [vmem:[%s3072_s5 + $0x20] sm:$0xff]  ;;  %v2860_v19 = vld [vmem:[%s3072_s5 + $0x28] sm:$0xff] }
   0x9   :  { %2341 = vmatpush3.bf16.msra.mxu0 %v2338_v5  ;;  %2351 = vmatprep.subr.bf16.mxu1 %v2350_v20 }
   0xa   :  { %2343 = vmatprep.subr.bf16.mxu0 %v2342_v12 }
   0xc   :  { %2353 = vmatpush3.bf16.msra.mxu1 %v2350_v20 }
   0xd   :  { %2345 = vmatpush3.bf16.msra.mxu0 %v2342_v12  ;;  %2354 = vmatprep.subr.bf16.mxu1 %v2533_v21 }
   0xe   :  { %2360 = vmatprep.subr.bf16.mxu0 %v2533_v21 }
  0x10   :  { %2103 = vmatmul.mubr.msk.f32.vlgmr.msra.gmra.mrb[0].mxu0 %vm69_vm0, %v60_v15 }
  0x11   :  { %2105 = vmatprep.mubr.msk.f32.mxu0 %vm69_vm0, %v61_v16 }
  0x14   :  { %2106 = vmatmul.mubr.msk.f32.gmra.mrb[2].mxu0 %vm69_vm0, %v62_v17 }
  0x15   :  { %2141 = vmatprep.mubr.msk.f32.mxu0 %vm2534_vm1, %v2535_v22 }
  0x77   :  { %v267_v38 = vpop.permute.xlu0 %266 }
  0xe3   :  { %v2104_v26 = vpop.f32.mrb[0].mxu0 }
  0xe4   :  { %v148_v27 = vpop.f32.mrb[1].mxu0  ;;  %v154_v30 = vadd.f32 %v2104_v26, %v2651_v23 }
  0xe5   :  { %v149_v28 = vadd.f32 %v2651_v23, %v148_v27 }
  0xe7   :  { %2116 = vmatprep.mubr.msk.f32.mxu1 %vm167_vm2, %v149_v28  ;;  %v2107_v33 = vpop.f32.mrb[2].mxu0 }
  0xe8   :  { %v164_v34 = vadd.f32 %v2107_v33, %v2651_v23  ;;  %2117 = vmatmul.mubr.msk.f32.vlgmr.msra.gmra.mrb[0].mxu1 %vm167_vm2, %v154_v30  ;;  %v158_v35 = vpop.f32.mrb[3].mxu0  ;;  %v2737_v30 = vpack.i.bf16 %v2675_v32, %v2670_v31 }
  0xe9   :  { %v159_v36 = vadd.f32 %v2651_v23, %v158_v35  ;;  %2356 = vmatpush3.bf16.msra.mxu1 %v2355_v29 }
  0xea   :  { %2357 = vmatprep.subr.bf16.mxu1 %v2533_v21 }
  0xeb   :  { %2119 = vmatprep.mubr.msk.f32.mxu1 %vm167_vm2, %v159_v36 }
  0xec   :  { %2120 = vmatmul.mubr.msk.f32.gmra.mrb[2].mxu1 %vm167_vm2, %v164_v34 }
  0xed   :  { %2359 = vmatpush3.bf16.msra.mxu1 %v2358_v37  ;;  %2130 = vmatprep.mubr.msk.f32.mxu1 %vm2534_vm1, %v2535_v22 }
  0xee   :  { %2368 = vmatprep.subr.bf16.mxu1 %v2533_v21 }
  0xf0   :  { %2131 = vmatmul.mubr.msk.f32.vlgmr.msra.gmra.mrb[4].mxu1 %vm167_vm2, %v267_v38 }
  0xf1   :  { %2152 = vmatprep.mubr.msk.f32.mxu1 %vm2534_vm1, %v2535_v22 }
 0x1bb   :  { %v2118_v39 = vpop.f32.mrb[0].mxu1 }
 0x1bc   :  { %v246_v40 = vpop.f32.mrb[1].mxu1 }
 0x1bd   :  { %v2698_v42 = vpack.c.bf16 %v2118_v39, %v246_v40  ;;  %v2464_v43 = vpack.i.bf16 %v2118_v39, %v246_v40 }
 0x1bf   :  { %2465 = vrot.lane.b32.xlu1 %v2464_v43, %s2532_s13  ;;  %2363 = vmatpush3.bf16.xpose.msk.msra.mxu0 %vm2694_vm3, %v2698_v42  ;;  %v2121_v44 = vpop.f32.mrb[2].mxu1 }
 0x1c0   :  { %v256_v45 = vpop.f32.mrb[3].mxu1  ;;  %2364 = vmatprep.subr.bf16.mxu0 %v2533_v21 }
 0x1c1   :  { %v2469_v46 = vpack.i.bf16 %v2121_v44, %v256_v45  ;;  %v2705_v47 = vpack.c.bf16 %v2121_v44, %v256_v45 }
 0x1c3   :  { %2470 = vrot.lane.b32.xlu1 %v2469_v46, %s2532_s13  ;;  %v336_v48 = vpop.f32.mrb[4].mxu1 }
 0x1c4   :  { %v2132_v49 = vpop.f32.mrb[5].mxu1 }
 0x1c7   :  { %2367 = vmatpush3.bf16.xpose.msk.msra.mxu0 %vm2694_vm3, %v2705_v47 }
 0x1c8   :  { %2380 = vmatprep.subr.bf16.mxu0 %v2533_v21 }
 0x1ce   :  { %2142 = vmatmul.mubr.msk.f32.vlgmr.msra.gmra.mrb[4].mxu0 %vm167_vm2, %v336_v48  ;;  %v2781_v48 = vld [vmem:[%s3072_s5 + $0x8] sm:$0xff] }
 0x1cf   :  { %2382 = vmatpush3.bf16.msra.mxu0 %v2355_v29  ;;  %2174 = vmatprep.mubr.msk.f32.mxu0 %vm2534_vm1, %v2535_v22  ;;  %v2731_v29 = vpack.i.bf16 %v2661_v25, %v2656_v24 }
 0x1d0   :  { %2383 = vmatprep.subr.bf16.mxu0 %v2533_v21 }
 0x1d1   :  { %2475 = vrot.lane.b32.xlu1 %v2731_v29, %s2532_s13 }
 0x1d3   :  { %2385 = vmatpush3.bf16.msra.mxu0 %v2358_v37 }
 0x1d4   :  { %2394 = vmatprep.subr.bf16.mxu0 %v2533_v21 }
 0x1d5   :  { %2480 = vrot.lane.b32.xlu1 %v2737_v30, %s2532_s13 }
 0x231   :  { %v2466_v50 = vpop.permute.xlu1 %2465 }
 0x232   :  { %v2468_v51 = vunpack.i.h.bf16 %v2466_v50  ;;  %v2467_v52 = vunpack.i.l.bf16 %v2466_v50 }
 0x234   :  { %v2717_v53 = vpack.c.bf16 %v2468_v51, %v2467_v52 }
 0x235   :  { %v2471_v54 = vpop.permute.xlu1 %2470 }
 0x236   :  { %2370 = vmatpush3.bf16.msra.mxu1 %v2717_v53  ;;  %v2473_v55 = vunpack.i.h.bf16 %v2471_v54  ;;  %v2472_v56 = vunpack.i.l.bf16 %v2471_v54 }
 0x237   :  { %2371 = vmatprep.subr.bf16.mxu1 %v2533_v21 }
 0x238   :  { %v2721_v57 = vpack.c.bf16 %v2473_v55, %v2472_v56 }
 0x23a   :  { %2373 = vmatpush3.bf16.msra.mxu1 %v2721_v57 }
 0x23b   :  { %2374 = vmatprep.subr.bf16.mxu1 %v2533_v21 }
 0x243   :  { %v2476_v35 = vpop.permute.xlu1 %2475 }
 0x244   :  { %v2478_v36 = vunpack.i.h.bf16 %v2476_v35  ;;  %v2477_v37 = vunpack.i.l.bf16 %v2476_v35 }
 0x246   :  { %v2741_v24 = vpack.c.bf16 %v2478_v36, %v2477_v37 }
 0x247   :  { %v2481_v38 = vpop.permute.xlu1 %2480 }
 0x248   :  { %v2483_v25 = vunpack.i.h.bf16 %v2481_v38  ;;  %v2482_v40 = vunpack.i.l.bf16 %v2481_v38 }
 0x24a   :  { %v2744_v31 = vpack.c.bf16 %v2483_v25, %v2482_v40  ;;  %v29_v25 = vld [vmem:[%s3067_s1 + $0x30] sm:$0xff] }
 0x2a1   :  { %v421_v58 = vpop.f32.mrb[4].mxu0 }
 0x2a2   :  { %v422_v59 = vadd.f32 %v421_v58, %v2602_v9  ;;  %v2143_v60 = vpop.f32.mrb[5].mxu0 }
 0x2a4   :  { %v425_v61 = vsel %vm167_vm2, %v422_v59, -inf }
 0x2a5   :  { %v426_v62 = vrot.slane %v425_v61, 4 }
 0x2a7   :  { %v427_v63 = vmax.f32 %v425_v61, %v426_v62 }
 0x2a9   :  { %v428_v0 = vrot.slane %v427_v63, 2 }
 0x2ab   :  { %v429_v1 = vmax.f32 %v427_v63, %v428_v0 }
 0x2ad   :  { %v430_v2 = vrot.slane %v429_v1, 1 }
 0x2af   :  { %v431_v3 = vmax.f32 %v429_v1, %v430_v2 }
 0x2b1   :  { %v432_v4 = vsub.f32 %v422_v59, %v431_v3 }
 0x2b3   :  { %v433_v5 = vmul.f32 1.442695, %v432_v4 }
 0x2b5   :  { %2516 = vpow2.f32 %v433_v5 }
 0x2bf   :  { %v2517_v6 = vpop.eup %2516 }
 0x2c0   :  { %v435_v7 = vsel %vm167_vm2, %v2517_v6, 0.0 }
 0x2c1   :  { %v436_v8 = vrot.slane %v435_v7, 4 }
 0x2c3   :  { %v437_v12 = vadd.f32 %v436_v8, %v435_v7 }
 0x2c5   :  { %v438_v14 = vrot.slane %v437_v12, 2 }
 0x2c7   :  { %v439_v15 = vadd.f32 %v438_v14, %v437_v12 }
 0x2c9   :  { %v440_v16 = vrot.slane %v439_v15, 1 }
 0x2cb   :  { %v441_v17 = vadd.f32 %v440_v16, %v439_v15 }
 0x2cd   :  { %v442_v20 = vadd.f32 1e-08, %v441_v17 }
 0x2cf   :  { %2518 = vrcp.f32 %v442_v20  ;;  %v2794_v20 = vld [vmem:[%s3072_s5 + $0x10] sm:$0xff] }
 0x2d9   :  { %v2519_v26 = vpop.eup %2518 }
 0x2da   :  { %v444_v27 = vmul.f32 %v2519_v26, %v2517_v6  ;;  %v2799_v26 = vld [vmem:[%s3072_s5 + $0x18] sm:$0xff] }
 0x2dc   :  { %v445_v28 = vsel %vm167_vm2, %v444_v27, 0.0 }
 0x2dd   :  { %446 = vadd.xlane.f32.xlu0 %v445_v28 }
 0x36a   :  { %v447_v33 = vpop.xlane.xlu0 %446 }
 0x36b   :  { %v448_v34 = vadd.f32 1e-08, %v447_v33 }
 0x36d   :  { %2520 = vrcp.f32 %v448_v34 }
 0x377   :  { %v2521_v39 = vpop.eup %2520 }
 0x378   :  { %v450_v43 = vmul.f32 %v2521_v39, %v444_v27  ;;  %v2489_v27 = vpack.i.bf16 %v2799_v26, %v2794_v20 }
 0x37a   :  { %2153 = vmatmul.mubr.msk.f32.vlgmr.msra.gmra.mrb[6].mxu1 %vm167_vm2, %v450_v43 }
 0x37b   :  { %2376 = vmatpush3.bf16.msra.mxu1 %v2741_v24  ;;  %2163 = vmatprep.mubr.msk.f32.mxu1 %vm2534_vm1, %v2535_v22 }
 0x37c   :  { %2377 = vmatprep.subr.bf16.mxu1 %v2533_v21 }
 0x37f   :  { %2379 = vmatpush3.bf16.msra.mxu1 %v2744_v31 }
 0x380   :  { %2386 = vmatprep.subr.bf16.mxu1 %v2533_v21 }
 0x44d   :  { %v532_v32 = vpop.f32.mrb[6].mxu1 }
 0x44e   :  { %v2154_v44 = vpop.f32.mrb[7].mxu1  ;;  %2164 = vmatmul.mubr.msk.f32.vlgmr.msra.gmra.mrb[8].mxu1 %vm167_vm2, %v532_v32 }
 0x44f   :  { %2389 = vmatpush3.bf16.xpose.msk.msra.mxu1 %vm2694_vm3, %v2698_v42  ;;  %2185 = vmatprep.mubr.msk.f32.mxu1 %vm2534_vm1, %v2535_v22 }
 0x450   :  { %2390 = vmatprep.subr.bf16.mxu1 %v2533_v21 }
 0x457   :  { %2393 = vmatpush3.bf16.xpose.msk.msra.mxu1 %vm2694_vm3, %v2705_v47  ;;  %v2776_v47 = vld [vmem:[%s3072_s5] sm:$0xff] }
 0x458   :  { %2406 = vmatprep.subr.bf16.mxu1 %v2533_v21  ;;  %v2484_v49 = vpack.i.bf16 %v2781_v48, %v2776_v47 }
 0x45a   :  { %2485 = vrot.lane.b32.xlu0 %v2484_v49, %s2536_s17 }
 0x45e   :  { %2495 = vrot.lane.b32.xlu0 %v2731_v29, %s2537_s22 }
 0x462   :  { %2500 = vrot.lane.b32.xlu0 %v2737_v30, %s2537_s22 }
 0x466   :  { %2505 = vrot.lane.b32.xlu0 %v2504_v13, %s2537_s22 }
 0x46a   :  { %2510 = vrot.lane.b32.xlu0 %v2509_v10, %s2537_s22 }
 0x4cc   :  { %v2486_v7 = vpop.permute.xlu0 %2485 }
 0x4cd   :  { %v2488_v8 = vunpack.i.h.bf16 %v2486_v7  ;;  %v2487_v12 = vunpack.i.l.bf16 %v2486_v7 }
 0x4cf   :  { %v2407_v14 = vpack.c.bf16 %v2488_v8, %v2487_v12 }
 0x4d0   :  { %v2496_v29 = vpop.permute.xlu0 %2495 }
 0x4d1   :  { %v2498_v43 = vunpack.i.h.bf16 %v2496_v29 }
 0x4d4   :  { %v2501_v32 = vpop.permute.xlu0 %2500 }
 0x4d8   :  { %v2506_v11 = vpop.permute.xlu0 %2505 }
 0x4d9   :  { %v2508_v13 = vunpack.i.h.bf16 %v2506_v11 }
 0x521   :  { %v621_v45 = vpop.f32.mrb[8].mxu1 }
 0x522   :  { %v2165_v46 = vpop.f32.mrb[9].mxu1  ;;  %2175 = vmatmul.mubr.msk.f32.vlgmr.msra.gmra.mrb[6].mxu0 %vm167_vm2, %v621_v45 }
 0x523   :  { %2396 = vmatpush3.bf16.msra.mxu0 %v2717_v53  ;;  %2196 = vmatprep.mubr.msk.f32.mxu0 %vm2534_vm1, %v2535_v22 }
 0x524   :  { %2397 = vmatprep.subr.bf16.mxu0 %v2533_v21 }
 0x527   :  { %2399 = vmatpush3.bf16.msra.mxu0 %v2721_v57 }
 0x528   :  { %2400 = vmatprep.subr.bf16.mxu0 %v2533_v21 }
 0x5f5   :  { %v694_v42 = vpop.f32.mrb[6].mxu0 }
 0x5f6   :  { %v2176_v41 = vpop.f32.mrb[7].mxu0  ;;  %2186 = vmatmul.mubr.msk.f32.vlgmr.msra.gmra.mrb[10].mxu1 %vm167_vm2, %v694_v42  ;;  %v2503_v42 = vunpack.i.h.bf16 %v2501_v32 }
 0x5f7   :  { %2218 = vmatprep.mubr.msk.f32.mxu1 %vm2534_vm1, %v2535_v22  ;;  %2408 = vmatpush3.bf16.msra.mxu1 %v2407_v14  ;;  %v2502_v41 = vunpack.i.l.bf16 %v2501_v32 }
 0x5f8   :  { %2409 = vmatprep.subr.bf16.mxu1 %v2533_v21 }
 0x5f9   :  { %v2416_v30 = vpack.c.bf16 %v2503_v42, %v2502_v41 }
 0x6c9   :  { %v767_v50 = vpop.f32.mrb[10].mxu1 }
 0x6ca   :  { %v768_v51 = vadd.f32 %v767_v50, %v2602_v9  ;;  %v2187_v52 = vpop.f32.mrb[11].mxu1 }
 0x6cc   :  { %v771_v53 = vsel %vm167_vm2, %v768_v51, -inf }
 0x6cd   :  { %v772_v54 = vrot.slane %v771_v53, 4 }
 0x6cf   :  { %v773_v55 = vmax.f32 %v771_v53, %v772_v54 }
 0x6d1   :  { %v774_v56 = vrot.slane %v773_v55, 2 }
 0x6d3   :  { %v775_v57 = vmax.f32 %v773_v55, %v774_v56  ;;  %v2865_v55 = vld [vmem:[%s3072_s5 + $0x30] sm:$0xff]  ;;  %v2874_v56 = vld [vmem:[%s3072_s5 + $0x38] sm:$0xff] }
 0x6d5   :  { %v776_v58 = vrot.slane %v775_v57, 1 }
 0x6d7   :  { %v777_v59 = vmax.f32 %v775_v57, %v776_v58  ;;  %v2879_v57 = vld [vmem:[%s3072_s5 + $0x40] sm:$0xff]  ;;  %v2888_v58 = vld [vmem:[%s3072_s5 + $0x48] sm:$0xff] }
 0x6d9   :  { %v778_v60 = vsub.f32 %v768_v51, %v777_v59  ;;  %v2507_v51 = vunpack.i.l.bf16 %v2506_v11  ;;  %v2893_v59 = vld [vmem:[%s3072_s5 + $0x50] sm:$0xff] }
 0x6db   :  { %v779_v61 = vmul.f32 1.442695, %v778_v60  ;;  %v2422_v52 = vpack.c.bf16 %v2508_v13, %v2507_v51  ;;  %v2511_v60 = vpop.permute.xlu0 %2510 }
 0x6dd   :  { %2522 = vpow2.f32 %v779_v61  ;;  %v2902_v61 = vld [vmem:[%s3072_s5 + $0x58] sm:$0xff] }
 0x6e7   :  { %v2523_v62 = vpop.eup %2522 }
 0x6e8   :  { %v781_v63 = vsel %vm167_vm2, %v2523_v62, 0.0 }
 0x6e9   :  { %v782_v0 = vrot.slane %v781_v63, 4 }
 0x6eb   :  { %v783_v1 = vadd.f32 %v782_v0, %v781_v63  ;;  %v2512_v63 = vunpack.i.l.bf16 %v2511_v60  ;;  %v2907_v0 = vld [vmem:[%s3072_s5 + $0x60] sm:$0xff] }
 0x6ed   :  { %v784_v2 = vrot.slane %v783_v1, 2 }
 0x6ef   :  { %v785_v3 = vadd.f32 %v784_v2, %v783_v1  ;;  %v2916_v2 = vld [vmem:[%s3072_s5 + $0x68] sm:$0xff] }
 0x6f1   :  { %v786_v4 = vrot.slane %v785_v3, 1 }
 0x6f3   :  { %v787_v5 = vadd.f32 %v786_v4, %v785_v3  ;;  %v2921_v3 = vld [vmem:[%s3072_s5 + $0x70] sm:$0xff]  ;;  %v2930_v4 = vld [vmem:[%s3072_s5 + $0x78] sm:$0xff] }
 0x6f5   :  { %v788_v6 = vadd.f32 1e-08, %v787_v5  ;;  %v2939_v5 = vld [vmem:[%s3071_s3] ss:$0 sm:$0xff]  ;;  %s2539_s3 = smov 40  }
 0x6f7   :  { %2524 = vrcp.f32 %v788_v6 }
 0x701   :  { %v2525_v15 = vpop.eup %2524 }
 0x702   :  { %v790_v16 = vmul.f32 %v2525_v15, %v2523_v62  ;;  %v2513_v62 = vunpack.i.h.bf16 %v2511_v60 }
 0x704   :  { %v791_v17 = vsel %vm167_vm2, %v790_v16, 0.0  ;;  %v2426_v1 = vpack.c.bf16 %v2513_v62, %v2512_v63 }
 0x705   :  { %792 = vadd.xlane.f32.xlu1 %v791_v17 }
 0x716   :  { %2490 = vrot.lane.b32.xlu1 %v2489_v27, %s2536_s17 }
 0x71a   :  { %1541 = vrot.lane.b32.xlu1 %v2939_v5, %s2537_s22 }
 0x792   :  { %v793_v28 = vpop.xlane.xlu1 %792 }
 0x793   :  { %v794_v33 = vadd.f32 1e-08, %v793_v28 }
 0x795   :  { %2526 = vrcp.f32 %v794_v33 }
 0x796   :  { %v2491_v34 = vpop.permute.xlu1 %2490 }
 0x797   :  { %v2493_v35 = vunpack.i.h.bf16 %v2491_v34  ;;  %v2492_v36 = vunpack.i.l.bf16 %v2491_v34 }
 0x799   :  { %v2410_v37 = vpack.c.bf16 %v2493_v35, %v2492_v36 }
 0x79b   :  { %2411 = vmatpush3.bf16.msra.mxu1 %v2410_v37 }
 0x79e   :  { %2219 = vmatmul.mubr.msk.f32.vlgmr.msra.gmra.mrb[12].mxu1 %vm167_vm2, %v790_v16 }
 0x79f   :  { %v2527_v38 = vpop.eup %2526  ;;  %2238 = vmatprep.mubr.msk.f32.mxu1 %vm1120_vm4, %v2776_v47 }
 0x7a0   :  { %v796_v39 = vmul.f32 %v2527_v38, %v790_v16 }
 0x7a2   :  { %2197 = vmatmul.mubr.msk.f32.vlgmr.msra.gmra.mrb[8].mxu0 %vm167_vm2, %v796_v39 }
 0x7a3   :  { %2402 = vmatpush3.bf16.msra.mxu0 %v2741_v24  ;;  %2207 = vmatprep.mubr.msk.f32.mxu0 %vm2534_vm1, %v2535_v22  ;;  %v30_v24 = vld [vmem:[%s3067_s1 + $0x38] sm:$0xff] }
 0x7a4   :  { %2403 = vmatprep.subr.bf16.mxu0 %v2533_v21  ;;  %v2418_v40 = vpack.c.bf16 %v30_v24, %v29_v25 }
 0x7a6   :  { %2419 = vmatprep.subr.bf16.mxu1 %v2418_v40 }
 0x7a7   :  { %2405 = vmatpush3.bf16.msra.mxu0 %v2744_v31  ;;  %2421 = vmatpush3.bf16.msra.mxu1 %v2418_v40  ;;  %v2497_v31 = vunpack.i.l.bf16 %v2496_v29 }
 0x7a8   :  { %2412 = vmatprep.subr.bf16.mxu0 %v2533_v21 }
 0x7a9   :  { %v2413_v46 = vpack.c.bf16 %v2498_v43, %v2497_v31  ;;  %v2963_v31 = vpop.permute.xlu1 %1541 }
 0x871   :  { %v2826_v44 = vpop.f32.mrb[12].mxu1 }
 0x872   :  { %v2220_v45 = vpop.f32.mrb[13].mxu1 }
 0x875   :  { %v866_v49 = vpop.f32.mrb[8].mxu0 }
 0x876   :  { %v2198_v50 = vpop.f32.mrb[9].mxu0  ;;  %2208 = vmatmul.mubr.msk.f32.vlgmr.msra.gmra.mrb[10].mxu0 %vm167_vm2, %v866_v49 }
 0x877   :  { %2414 = vmatpush3.bf16.msra.mxu0 %v2413_v46  ;;  %2229 = vmatprep.mubr.msk.f32.mxu0 %vm2534_vm1, %v2535_v22 }
 0x878   :  { %2415 = vmatprep.subr.bf16.mxu0 %v2533_v21 }
 0x87b   :  { %2417 = vmatpush3.bf16.msra.mxu0 %v2416_v30 }
 0x87c   :  { %2423 = vmatprep.subr.bf16.mxu0 %v2422_v52 }
 0x949   :  { %v2837_v53 = vpop.f32.mrb[10].mxu0 }
 0x94a   :  { %v2209_v54 = vpop.f32.mrb[11].mxu0  ;;  %2230 = vmatmul.mubr.msk.f32.vlgmr.msra.gmra.mrb[12].mxu0 %vm167_vm2, %v2837_v53  ;;  %2236 = vmatprep.subr.mxu1 %v2837_v53 }
 0x94b   :  { %2237 = vmatpush3.msra.mxu1 %v2837_v53  ;;  %2425 = vmatpush3.bf16.msra.mxu0 %v2422_v52 }
 0x94c   :  { %2239 = vmatmul.mubr.msk.f32.vlgmr.msra.gmra.mrb[14].mxu1 %vm1120_vm4, %v2781_v48  ;;  %2430 = vmatprep.subr.bf16.mxu1 %v2533_v21 }
 0x94d   :  { %2241 = vmatprep.mubr.msk.f32.mxu1 %vm1120_vm4, %v2794_v20  ;;  %2427 = vmatprep.subr.bf16.mxu0 %v2426_v1 }
 0x94f   :  { %2429 = vmatpush3.bf16.msra.mxu0 %v2426_v1 }
 0x950   :  { %2242 = vmatmul.mubr.msk.f32.gmra.mrb[16].mxu1 %vm1120_vm4, %v2799_v26 }
 0x951   :  { %2244 = vmatprep.mubr.msk.f32.mxu1 %vm1120_vm4, %v2851_v18 }
 0x954   :  { %2245 = vmatmul.mubr.msk.f32.gmra.mrb[18].mxu1 %vm1120_vm4, %v2860_v19 }
 0x955   :  { %2247 = vmatprep.mubr.msk.f32.mxu1 %vm1120_vm4, %v2865_v55 }
 0x958   :  { %2248 = vmatmul.mubr.msk.f32.gmra.mrb[20].mxu1 %vm1120_vm4, %v2874_v56 }
 0x959   :  { %2250 = vmatprep.mubr.msk.f32.mxu1 %vm1120_vm4, %v2879_v57 }
 0x95c   :  { %2251 = vmatmul.mubr.msk.f32.gmra.mrb[22].mxu1 %vm1120_vm4, %v2888_v58 }
 0x95d   :  { %2253 = vmatprep.mubr.msk.f32.mxu1 %vm1120_vm4, %v2893_v59 }
 0x960   :  { %2254 = vmatmul.mubr.msk.f32.gmra.mrb[24].mxu1 %vm1120_vm4, %v2902_v61 }
 0x961   :  { %2256 = vmatprep.mubr.msk.f32.mxu1 %vm1120_vm4, %v2907_v0 }
 0x964   :  { %2257 = vmatmul.mubr.msk.f32.gmra.mrb[26].mxu1 %vm1120_vm4, %v2916_v2 }
 0x965   :  { %2259 = vmatprep.mubr.msk.f32.mxu1 %vm1120_vm4, %v2921_v3 }
 0x968   :  { %2260 = vmatmul.mubr.msk.f32.gmra.mrb[28].mxu1 %vm1120_vm4, %v2930_v4 }
 0x969   :  { %2326 = vmatprep.mubr.msk.f32.mxu1 %vm2534_vm1, %v2535_v22 }
 0xa1d   :  { %v2943_v6 = vpop.f32.mrb[12].mxu0 }
 0xa1e   :  { %v2231_v7 = vpop.f32.mrb[13].mxu0 }
 0xa1f   :  { %v2240_v8 = vpop.f32.mrb[14].mxu1 }
 0xa20   :  { %v1231_v12 = vpop.f32.mrb[15].mxu1 }
 0xa21   :  { %2270 = vmatprep.mubr.msk.f32.mxu0 %vm167_vm2, %v1231_v12 }
 0xa22   :  { %2271 = vmatmul.mubr.msk.f32.vlgmr.msra.gmra.mrb[14].mxu0 %vm167_vm2, %v2240_v8 }
 0xa23   :  { %v2243_v14 = vpop.f32.mrb[16].mxu1 }
 0xa24   :  { %v1241_v15 = vpop.f32.mrb[17].mxu1 }
 0xa25   :  { %2273 = vmatprep.mubr.msk.f32.mxu0 %vm167_vm2, %v1241_v15 }
 0xa26   :  { %2274 = vmatmul.mubr.msk.f32.gmra.mrb[16].mxu0 %vm167_vm2, %v2243_v14 }
 0xa27   :  { %v2246_v16 = vpop.f32.mrb[18].mxu1 }
 0xa28   :  { %v1251_v17 = vpop.f32.mrb[19].mxu1 }
 0xa29   :  { %2276 = vmatprep.mubr.msk.f32.mxu0 %vm167_vm2, %v1251_v17 }
 0xa2a   :  { %2277 = vmatmul.mubr.msk.f32.gmra.mrb[18].mxu0 %vm167_vm2, %v2246_v16 }
 0xa2b   :  { %v2249_v27 = vpop.f32.mrb[20].mxu1 }
 0xa2c   :  { %v1261_v28 = vpop.f32.mrb[21].mxu1 }
 0xa2d   :  { %2279 = vmatprep.mubr.msk.f32.mxu0 %vm167_vm2, %v1261_v28 }
 0xa2e   :  { %2280 = vmatmul.mubr.msk.f32.gmra.mrb[20].mxu0 %vm167_vm2, %v2249_v27 }
 0xa2f   :  { %v2252_v33 = vpop.f32.mrb[22].mxu1 }
 0xa30   :  { %v1271_v34 = vpop.f32.mrb[23].mxu1 }
 0xa31   :  { %2282 = vmatprep.mubr.msk.f32.mxu0 %vm167_vm2, %v1271_v34 }
 0xa32   :  { %2283 = vmatmul.mubr.msk.f32.gmra.mrb[22].mxu0 %vm167_vm2, %v2252_v33 }
 0xa33   :  { %v2255_v35 = vpop.f32.mrb[24].mxu1 }
 0xa34   :  { %v1281_v36 = vpop.f32.mrb[25].mxu1 }
 0xa35   :  { %2285 = vmatprep.mubr.msk.f32.mxu0 %vm167_vm2, %v1281_v36 }
 0xa36   :  { %2286 = vmatmul.mubr.msk.f32.gmra.mrb[24].mxu0 %vm167_vm2, %v2255_v35 }
 0xa37   :  { %v2258_v37 = vpop.f32.mrb[26].mxu1 }
 0xa38   :  { %v1291_v38 = vpop.f32.mrb[27].mxu1 }
 0xa39   :  { %2288 = vmatprep.mubr.msk.f32.mxu0 %vm167_vm2, %v1291_v38 }
 0xa3a   :  { %2289 = vmatmul.mubr.msk.f32.gmra.mrb[26].mxu0 %vm167_vm2, %v2258_v37 }
 0xa3b   :  { %v2261_v39 = vpop.f32.mrb[28].mxu1 }
 0xa3c   :  { %v1301_v25 = vpop.f32.mrb[29].mxu1 }
 0xa3d   :  { %2291 = vmatprep.mubr.msk.f32.mxu0 %vm167_vm2, %v1301_v25 }
 0xa3e   :  { %2292 = vmatmul.mubr.msk.f32.gmra.mrb[28].mxu0 %vm167_vm2, %v2261_v39 }
 0xaf5   :  { %v2272_v24 = vpop.f32.mrb[14].mxu0 }
 0xaf6   :  { %v1452_v40 = vadd.f32 %v2272_v24, %v2939_v5  ;;  %v1446_v29 = vpop.f32.mrb[15].mxu0 }
 0xaf7   :  { %v1447_v43 = vadd.f32 %v2939_v5, %v1446_v29 }
 0xaf8   :  { %v1526_v32 = vmax.f32 %v1452_v40, 0.0 }
 0xaf9   :  { %v1525_v45 = vmax.f32 %v1447_v43, 0.0  ;;  %v2275_v46 = vpop.f32.mrb[16].mxu0 }
 0xafa   :  { %v1462_v42 = vadd.f32 %v2275_v46, %v2939_v5  ;;  %v1456_v41 = vpop.f32.mrb[17].mxu0  ;;  %v1545_v49 = vmul.f32 %v2963_v31, %v1526_v32 }
 0xafb   :  { %v1457_v50 = vadd.f32 %v2939_v5, %v1456_v41  ;;  %v1544_v30 = vmul.f32 %v2963_v31, %v1525_v45 }
 0xafc   :  { %v1528_v10 = vmax.f32 %v1462_v42, 0.0  ;;  %v1564_v11 = vsel %vm1560_vm5, %v1545_v49, 0.0 }
 0xafd   :  { %v1527_v13 = vmax.f32 %v1457_v50, 0.0  ;;  %1565 = vadd.xlane.f32.xlu1 %v1564_v11  ;;  %v2278_v51 = vpop.f32.mrb[18].mxu0  ;;  %v1561_v52 = vsel %vm1560_vm5, %v1544_v30, 0.0 }
 0xafe   :  { %v1472_v54 = vadd.f32 %v2278_v51, %v2939_v5  ;;  %1562 = vadd.xlane.f32.xlu0 %v1561_v52  ;;  %v1466_v60 = vpop.f32.mrb[19].mxu0  ;;  %v1547_v62 = vmul.f32 %v2963_v31, %v1528_v10 }
 0xaff   :  { %v1467_v63 = vadd.f32 %v2939_v5, %v1466_v60  ;;  %v1546_v14 = vmul.f32 %v2963_v31, %v1527_v13 }
 0xb00   :  { %v1530_v1 = vmax.f32 %v1472_v54, 0.0  ;;  %v1570_v7 = vsel %vm1560_vm5, %v1547_v62, 0.0  ;;  %v2538_v54 = vmov 40  }
 0xb01   :  { %v1529_v8 = vmax.f32 %v1467_v63, 0.0  ;;  %v2281_v12 = vpop.f32.mrb[20].mxu0  ;;  %v1567_v36 = vsel %vm1560_vm5, %v1546_v14, 0.0  ;;  %2514 = vset.pattern.permute.xlu0 %v2538_v54  ;;  %2515 = vset.pattern.permute.xlu1 %v2538_v54 }
 0xb02   :  { %v1482_v15 = vadd.f32 %v2281_v12, %v2939_v5  ;;  %1571 = vadd.xlane.f32.xlu0 %v1570_v7  ;;  %v1476_v16 = vpop.f32.mrb[21].mxu0  ;;  %v1549_v28 = vmul.f32 %v2963_v31, %v1530_v1 }
 0xb03   :  { %v1477_v17 = vadd.f32 %v2939_v5, %v1476_v16  ;;  %v1548_v27 = vmul.f32 %v2963_v31, %v1529_v8 }
 0xb04   :  { %v1532_v33 = vmax.f32 %v1482_v15, 0.0  ;;  %v1576_v40 = vsel %vm1560_vm5, %v1549_v28, 0.0 }
 0xb05   :  { %v1531_v34 = vmax.f32 %v1477_v17, 0.0  ;;  %v2284_v35 = vpop.f32.mrb[22].mxu0  ;;  %v1573_v37 = vsel %vm1560_vm5, %v1548_v27, 0.0 }
 0xb06   :  { %v1492_v38 = vadd.f32 %v2284_v35, %v2939_v5  ;;  %1568 = vadd.xlane.f32.xlu0 %v1567_v36  ;;  %1574 = vadd.xlane.f32.xlu1 %v1573_v37  ;;  %v1486_v39 = vpop.f32.mrb[23].mxu0  ;;  %v1551_v46 = vmul.f32 %v2963_v31, %v1532_v33 }
 0xb07   :  { %v1487_v25 = vadd.f32 %v2939_v5, %v1486_v39  ;;  %v1550_v24 = vmul.f32 %v2963_v31, %v1531_v34 }
 0xb08   :  { %v1534_v29 = vmax.f32 %v1492_v38, 0.0  ;;  %v1582_v13 = vsel %vm1560_vm5, %v1551_v46, 0.0 }
 0xb09   :  { %v1533_v43 = vmax.f32 %v1487_v25, 0.0  ;;  %v2287_v32 = vpop.f32.mrb[24].mxu0  ;;  %v1579_v45 = vsel %vm1560_vm5, %v1550_v24, 0.0 }
 0xb0a   :  { %v1502_v42 = vadd.f32 %v2287_v32, %v2939_v5  ;;  %1577 = vadd.xlane.f32.xlu0 %v1576_v40  ;;  %1580 = vadd.xlane.f32.xlu1 %v1579_v45  ;;  %v1496_v41 = vpop.f32.mrb[25].mxu0  ;;  %v1553_v52 = vmul.f32 %v2963_v31, %v1534_v29 }
 0xb0b   :  { %v1497_v49 = vadd.f32 %v2939_v5, %v1496_v41  ;;  %v1552_v50 = vmul.f32 %v2963_v31, %v1533_v43 }
 0xb0c   :  { %v1536_v30 = vmax.f32 %v1502_v42, 0.0  ;;  %v1588_v15 = vsel %vm1560_vm5, %v1553_v52, 0.0 }
 0xb0d   :  { %v1535_v10 = vmax.f32 %v1497_v49, 0.0  ;;  %v2290_v11 = vpop.f32.mrb[26].mxu0  ;;  %v1585_v51 = vsel %vm1560_vm5, %v1552_v50, 0.0 }
 0xb0e   :  { %v1512_v60 = vadd.f32 %v2290_v11, %v2939_v5  ;;  %1583 = vadd.xlane.f32.xlu0 %v1582_v13  ;;  %1586 = vadd.xlane.f32.xlu1 %v1585_v51  ;;  %v1506_v62 = vpop.f32.mrb[27].mxu0  ;;  %v1555_v7 = vmul.f32 %v2963_v31, %v1536_v30 }
 0xb0f   :  { %v1507_v63 = vadd.f32 %v2939_v5, %v1506_v62  ;;  %v1554_v1 = vmul.f32 %v2963_v31, %v1535_v10 }
 0xb10   :  { %v1538_v8 = vmax.f32 %v1512_v60, 0.0  ;;  %v1594_v34 = vsel %vm1560_vm5, %v1555_v7, 0.0 }
 0xb11   :  { %v1537_v12 = vmax.f32 %v1507_v63, 0.0  ;;  %v2293_v14 = vpop.f32.mrb[28].mxu0  ;;  %v1591_v16 = vsel %vm1560_vm5, %v1554_v1, 0.0 }
 0xb12   :  { %v1522_v17 = vadd.f32 %v2293_v14, %v2939_v5  ;;  %1589 = vadd.xlane.f32.xlu0 %v1588_v15  ;;  %1592 = vadd.xlane.f32.xlu1 %v1591_v16  ;;  %v1516_v27 = vpop.f32.mrb[29].mxu0  ;;  %v1557_v38 = vmul.f32 %v2963_v31, %v1538_v8 }
 0xb13   :  { %v1517_v28 = vadd.f32 %v2939_v5, %v1516_v27  ;;  %v1556_v33 = vmul.f32 %v2963_v31, %v1537_v12 }
 0xb14   :  { %v1540_v35 = vmax.f32 %v1522_v17, 0.0  ;;  %v1600_v25 = vsel %vm1560_vm5, %v1557_v38, 0.0 }
 0xb15   :  { %v1539_v36 = vmax.f32 %v1517_v28, 0.0  ;;  %v1597_v37 = vsel %vm1560_vm5, %v1556_v33, 0.0 }
 0xb16   :  { %1595 = vadd.xlane.f32.xlu0 %v1594_v34  ;;  %1598 = vadd.xlane.f32.xlu1 %v1597_v37  ;;  %v1559_v5 = vmul.f32 %v2963_v31, %v1540_v35 }
 0xb17   :  { %v1558_v39 = vmul.f32 %v2963_v31, %v1539_v36 }
 0xb18   :  { %v1606_v40 = vsel %vm1560_vm5, %v1559_v5, 0.0 }
 0xb19   :  { %v1603_v24 = vsel %vm1560_vm5, %v1558_v39, 0.0 }
 0xb1a   :  { %1601 = vadd.xlane.f32.xlu0 %v1600_v25  ;;  %1604 = vadd.xlane.f32.xlu1 %v1603_v24 }
 0xb1e   :  { %1607 = vadd.xlane.f32.xlu0 %v1606_v40 }
 0xb8a   :  { %v1566_v29 = vpop.xlane.xlu1 %1565 }
 0xb8b   :  { %v1610_v43 = vadd.f32 %v2651_v23, %v1566_v29  ;;  %v1563_v32 = vpop.xlane.xlu0 %1562 }
 0xb8c   :  { %v1609_v45 = vadd.f32 %v2651_v23, %v1563_v32 }
 0xb8d   :  { %1632 = vperm.xlu0 %2514, %v1610_v43  }
 0xb8e   :  { %1627 = vperm.xlu1 %2515, %v1609_v45  }
 0xb8f   :  { %v1572_v46 = vpop.xlane.xlu0 %1571 }
 0xb90   :  { %v1612_v42 = vadd.f32 %v2651_v23, %v1572_v46 }
 0xb92   :  { %1642 = vperm.xlu1 %2515, %v1612_v42  }
 0xb93   :  { %v1569_v41 = vpop.xlane.xlu0 %1568  ;;  %v1575_v49 = vpop.xlane.xlu1 %1574 }
 0xb94   :  { %v1611_v31 = vadd.f32 %v2651_v23, %v1569_v41  ;;  %v1613_v13 = vadd.f32 %v2651_v23, %v1575_v49 }
 0xb96   :  { %1637 = vperm.xlu1 %2515, %v1611_v31  }
 0xb97   :  { %v1578_v50 = vpop.xlane.xlu0 %1577  ;;  %v1581_v30 = vpop.xlane.xlu1 %1580 }
 0xb98   :  { %v1614_v10 = vadd.f32 %v2651_v23, %v1578_v50  ;;  %v1615_v1 = vadd.f32 %v2651_v23, %v1581_v30 }
 0xb9a   :  { %1652 = vperm.xlu1 %2515, %v1614_v10  }
 0xb9b   :  { %v1587_v11 = vpop.xlane.xlu1 %1586  ;;  %v1584_v51 = vpop.xlane.xlu0 %1583 }
 0xb9c   :  { %v1616_v54 = vadd.f32 %v2651_v23, %v1584_v51  ;;  %v1617_v16 = vadd.f32 %v2651_v23, %v1587_v11 }
 0xb9e   :  { %1647 = vperm.xlu1 %2515, %v1613_v13  }
 0xb9f   :  { %v1593_v52 = vpop.xlane.xlu1 %1592  ;;  %v1590_v62 = vpop.xlane.xlu0 %1589 }
 0xba0   :  { %v1619_v60 = vadd.f32 %v2651_v23, %v1593_v52  ;;  %v1618_v12 = vadd.f32 %v2651_v23, %v1590_v62 }
 0xba2   :  { %1677 = vperm.xlu0 %2514, %v1619_v60   ;;  %1662 = vperm.xlu1 %2515, %v1616_v54  }
 0xba3   :  { %v1599_v63 = vpop.xlane.xlu1 %1598  ;;  %v1596_v15 = vpop.xlane.xlu0 %1595 }
 0xba4   :  { %v1621_v7 = vadd.f32 %v2651_v23, %v1599_v63  ;;  %v1620_v27 = vadd.f32 %v2651_v23, %v1596_v15 }
 0xba6   :  { %1687 = vperm.xlu0 %2514, %v1621_v7   ;;  %1657 = vperm.xlu1 %2515, %v1615_v1  }
 0xba7   :  { %v1605_v8 = vpop.xlane.xlu1 %1604  ;;  %v1602_v17 = vpop.xlane.xlu0 %1601 }
 0xba8   :  { %v1623_v14 = vadd.f32 %v2651_v23, %v1605_v8  ;;  %v1622_v28 = vadd.f32 %v2651_v23, %v1602_v17 }
 0xbaa   :  { %1672 = vperm.xlu1 %2515, %v1618_v12   ;;  %1697 = vperm.xlu0 %2514, %v1623_v14  }
 0xbab   :  { %v1608_v33 = vpop.xlane.xlu0 %1607 }
 0xbac   :  { %v1624_v34 = vadd.f32 %v2651_v23, %v1608_v33 }
 0xbae   :  { %1667 = vperm.xlu1 %2515, %v1617_v16   ;;  %1802 = vrot.lane.b32.xlu0 %v2602_v9, %s2537_s22  ;;  %s2540_s22 = smov 32  }
 0xbb2   :  { %1682 = vperm.xlu1 %2515, %v1620_v27  }
 0xbb6   :  { %1692 = vperm.xlu1 %2515, %v1622_v28  }
 0xbba   :  { %1702 = vperm.xlu1 %2515, %v1624_v34  }
 0xbbe   :  { %1044 = vrot.lane.b32.xlu1 %v2651_v23, %s2532_s13 }
 0xbc2   :  { %1884 = vrot.lane.b32.xlu1 %v2826_v44, %s2539_s3 }
 0xc0c   :  { %v1633_v35 = vpop.permute.xlu0 %1632 }
 0xc0d   :  { %v1706_v9 = vmul.f32 %v1633_v35, %v2781_v48  ;;  %v1628_v36 = vpop.permute.xlu1 %1627 }
 0xc0e   :  { %v1705_v37 = vmul.f32 %v1628_v36, %v2776_v47 }
 0xc10   :  { %v2431_v38 = vpack.c.bf16 %v1706_v9, %v1705_v37 }
 0xc11   :  { %v1643_v39 = vpop.permute.xlu1 %1642 }
 0xc12   :  { %2432 = vmatpush3.bf16.msra.mxu1 %v2431_v38  ;;  %v1708_v24 = vmul.f32 %v1643_v39, %v2799_v26 }
 0xc13   :  { %2433 = vmatprep.subr.bf16.mxu1 %v2533_v21 }
 0xc15   :  { %v1638_v25 = vpop.permute.xlu1 %1637 }
 0xc16   :  { %v1707_v5 = vmul.f32 %v1638_v25, %v2794_v20 }
 0xc18   :  { %v2434_v23 = vpack.c.bf16 %v1708_v24, %v1707_v5 }
 0xc19   :  { %v1653_v40 = vpop.permute.xlu1 %1652 }
 0xc1a   :  { %2435 = vmatpush3.bf16.msra.mxu1 %v2434_v23  ;;  %v1710_v48 = vmul.f32 %v1653_v40, %v2860_v19 }
 0xc1b   :  { %2436 = vmatprep.subr.bf16.mxu1 %v2533_v21 }
 0xc1d   :  { %v1648_v44 = vpop.permute.xlu1 %1647 }
 0xc1e   :  { %v1709_v47 = vmul.f32 %v1648_v44, %v2851_v18 }
 0xc20   :  { %v2437_v29 = vpack.c.bf16 %v1710_v48, %v1709_v47 }
 0xc21   :  { %v1663_v43 = vpop.permute.xlu1 %1662  ;;  %v1678_v42 = vpop.permute.xlu0 %1677 }
 0xc22   :  { %2438 = vmatpush3.bf16.msra.mxu1 %v2437_v29  ;;  %v1712_v26 = vmul.f32 %v1663_v43, %v2874_v56  ;;  %v1715_v30 = vmul.f32 %v1678_v42, %v2893_v59 }
 0xc23   :  { %2439 = vmatprep.subr.bf16.mxu1 %v2533_v21 }
 0xc25   :  { %v1658_v32 = vpop.permute.xlu1 %1657  ;;  %v1688_v31 = vpop.permute.xlu0 %1687 }
 0xc26   :  { %v1711_v20 = vmul.f32 %v1658_v32, %v2865_v55  ;;  %v1717_v11 = vmul.f32 %v1688_v31, %v2907_v0  ;;  %v41_v0 = vld [vmem:[%s3069_s4] sm:$0xff]  ;;  %s2541_s4 = smov 56  }
 0xc28   :  { %v2440_v45 = vpack.c.bf16 %v1712_v26, %v1711_v20 }
 0xc29   :  { %v1673_v46 = vpop.permute.xlu1 %1672 }
 0xc2a   :  { %2441 = vmatpush3.bf16.msra.mxu1 %v2440_v45  ;;  %v1714_v19 = vmul.f32 %v1673_v46, %v2888_v58  ;;  %v1698_v58 = vpop.permute.xlu0 %1697 }
 0xc2b   :  { %2442 = vmatprep.subr.bf16.mxu1 %v2533_v21  ;;  %v1719_v52 = vmul.f32 %v1698_v58, %v2921_v3 }
 0xc2d   :  { %v1668_v41 = vpop.permute.xlu1 %1667 }
 0xc2e   :  { %v1713_v18 = vmul.f32 %v1668_v41, %v2879_v57  ;;  %v1803_v15 = vpop.permute.xlu0 %1802 }
 0xc30   :  { %v2443_v49 = vpack.c.bf16 %v1714_v19, %v1713_v18 }
 0xc31   :  { %v1683_v50 = vpop.permute.xlu1 %1682 }
 0xc32   :  { %v1716_v56 = vmul.f32 %v1683_v50, %v2902_v61  ;;  %2444 = vmatpush3.bf16.msra.mxu1 %v2443_v49 }
 0xc33   :  { %2445 = vmatprep.subr.bf16.mxu1 %v2533_v21 }
 0xc34   :  { %v2446_v55 = vpack.c.bf16 %v1716_v56, %v1715_v30 }
 0xc35   :  { %v1693_v10 = vpop.permute.xlu1 %1692 }
 0xc36   :  { %v1718_v13 = vmul.f32 %v1693_v10, %v2916_v2  ;;  %2447 = vmatpush3.bf16.msra.mxu1 %v2446_v55 }
 0xc37   :  { %2448 = vmatprep.subr.bf16.mxu1 %v2533_v21 }
 0xc38   :  { %v2449_v57 = vpack.c.bf16 %v1718_v13, %v1717_v11 }
 0xc39   :  { %v1703_v51 = vpop.permute.xlu1 %1702 }
 0xc3a   :  { %v1720_v59 = vmul.f32 %v1703_v51, %v2930_v4  ;;  %2450 = vmatpush3.bf16.msra.mxu1 %v2449_v57 }
 0xc3b   :  { %2451 = vmatprep.subr.bf16.mxu1 %v2533_v21 }
 0xc3c   :  { %v2452_v61 = vpack.c.bf16 %v1720_v59, %v1719_v52 }
 0xc3d   :  { %v1045_v54 = vpop.permute.xlu1 %1044 }
 0xc3e   :  { %v1117_v2 = vadd.f32 %v2943_v6, %v1045_v54  ;;  %2453 = vmatpush3.bf16.msra.mxu1 %v2452_v61 }
 0xc3f   :  { %2329 = vmatprep.subr.mxu1 %v2535_v22 }
 0xc40   :  { %1880 = vrot.lane.b32.xlu0 %v1117_v2, %s2540_s22 }
 0xc41   :  { %2327 = vmatmul.mubr.f32.vlgmr.msra.gmra.mrb[30].mxu1 %v41_v0  ;;  %v1885_v35 = vpop.permute.xlu1 %1884 }
 0xc42   :  { %2331 = vmatprep.mubr.msk.f32.mxu1 %vm2534_vm1, %v2535_v22 }
 0xcb2   :  { %v1881_v33 = vpop.permute.xlu0 %1880 }
 0xcb3   :  { %v1891_v34 = vsel %vm167_vm2, %v2837_v53, %v1881_v33 }
 0xcb4   :  { %v1893_v36 = vsel %vm1892_vm8, %v1891_v34, %v1885_v35 }
 0xd14   :  { %v1787_v3 = vpop.f32.mrb[30].mxu1 }
 0xd15   :  { %v1792_v21 = vsel %vm1791_vm6, %v1787_v3, -inf  ;;  %v2328_v4 = vpop.f32.mrb[31].mxu1 }
 0xd16   :  { %v1793_v60 = vrot.slane %v1792_v21, 4 }
 0xd18   :  { %v1794_v62 = vmax.f32 %v1792_v21, %v1793_v60 }
 0xd1a   :  { %v1795_v63 = vrot.slane %v1794_v62, 2 }
 0xd1c   :  { %v1796_v1 = vmax.f32 %v1794_v62, %v1795_v63 }
 0xd1e   :  { %v1797_v7 = vrot.slane %v1796_v1, 1 }
 0xd20   :  { %v1798_v8 = vmax.f32 %v1796_v1, %v1797_v7 }
 0xd22   :  { %v1799_v6 = vsub.f32 %v1787_v3, %v1798_v8 }
 0xd24   :  { %v1800_v12 = vmul.f32 1.442695, %v1799_v6 }
 0xd26   :  { %2528 = vpow2.f32 %v1800_v12 }
 0xd30   :  { %v2529_v14 = vpop.eup %2528 }
 0xd31   :  { %2330 = vmatpush3.msra.mxu1 %v2529_v14 }
 0xd32   :  { %2332 = vmatmul.mubr.msk.f32.vlgmr.msra.gmra.mrb[32].mxu1 %vm1804_vm7, %v1803_v15 }
 0xe05   :  { %v1873_v16 = vpop.f32.mrb[32].mxu1 }
 0xe06   :  { %v1874_v22 = vadd.f32 1e-08, %v1873_v16  ;;  %v2333_v17 = vpop.f32.mrb[33].mxu1 }
 0xe08   :  { %2530 = vrcp.f32 %v1874_v22 }
 0xe12   :  { %v2531_v27 = vpop.eup %2530 }
 0xe13   :  { %v1878_v28 = vmul.f32 %v2531_v27, %v2529_v14 }
 0xe15   :  { %1888 = vrot.lane.b32.xlu0 %v1878_v28, %s2541_s4 }
 0xe87   :  { %v1889_v9 = vpop.permute.xlu0 %1888 }
 0xe88   :  { %v1895_v37 = vsel %vm1894_vm9, %v1893_v36, %v1889_v9 }
 0xe89   :  { %v1897_v38 = vsel %vm1896_vm10, %v1895_v37, 0.0 }
 0xe8a   :  { %1898 = vst [vmem:[%s3073_s6] sm:$0xff] %v1897_v38 }

</bundles_post_ra>
